<compile_context>
chip_gen: v6e
topology: v6e:2x2x1
jax: 0.10.0
libtpu: 0.0.40
codegen_flags: <defaults>
</compile_context>

<pallas_src>
import functools

import jax
import jax.numpy as jnp
from jax.experimental import pallas as pl
from jax.experimental.pallas import tpu as pltpu


def _round_up(n, m):
    return (n + m - 1) // m * m


# ---------------------------------------------------------------------------
# Kernel
# ---------------------------------------------------------------------------
def _make_kernel(dim, dim_p, emb_dim, hidden):
    """Builds the fused forward kernel with static packed-weight offsets."""
    H = hidden
    r_w0t = dim_p            # W0 rows for the t_emb part (padded to H rows)
    r_w1 = dim_p + H
    r_w2 = dim_p + 2 * H
    r_w3 = dim_p + 3 * H

    def kernel(x_ref, t_ref, w_ref, b_ref, out_ref):
        # x_ref: bf16 [TB, dim]     t_ref: f32 [TB, 1]
        # w_ref: bf16 [K_total, H]  packed: [W0x | W0t(pad) | W1 | W2 | W3(pad)]
        # b_ref: f32  [8, H]        rows: b0, b1, b2, b3(pad), wt(pad), bt(pad)
        x = x_ref[...]
        t = t_ref[...]

        # time embedding: Linear(1, T) == t * w_row + b (K=1 matmul -> bcast
        # mul on the VPU).  Columns >= T are zero (zero-padded wt/bt rows).
        t_emb = (t * b_ref[4:5, :] + b_ref[5:6, :]).astype(jnp.bfloat16)  # [TB, H]

        # layer 0 on the (virtual) concatenation [x, t_emb]
        h = (jnp.dot(x, w_ref[0:dim, :], preferred_element_type=jnp.float32)
             + jnp.dot(t_emb, w_ref[r_w0t:r_w0t + H, :],
                       preferred_element_type=jnp.float32)
             + b_ref[0:1, :])
        h = jnp.maximum(h, 0.0).astype(jnp.bfloat16)                      # ReLU

        h = jnp.dot(h, w_ref[r_w1:r_w1 + H, :],
                    preferred_element_type=jnp.float32) + b_ref[1:2, :]
        h = jnp.maximum(h, 0.0).astype(jnp.bfloat16)

        h = jnp.dot(h, w_ref[r_w2:r_w2 + H, :],
                    preferred_element_type=jnp.float32) + b_ref[2:3, :]
        h = jnp.maximum(h, 0.0).astype(jnp.bfloat16)

        out = jnp.dot(h, w_ref[r_w3:r_w3 + H, :],
                      preferred_element_type=jnp.float32) + b_ref[3:4, :]
        out_ref[...] = out[:, :emb_dim]

    return kernel


# ---------------------------------------------------------------------------
# Wrapper
# ---------------------------------------------------------------------------
def generative_geo_ae_forward(x, t, packed, *, tile_b=1024):
    """x: [B, dim] f32, t: [B] or [B, 1]. Returns [B, emb_dim] f32."""
    w_packed, b_packed, meta = packed
    dim, dim_p = meta["dim"], meta["dim_p"]
    T, emb_dim, H = meta["T"], meta["emb_dim"], meta["hidden"]

    if t.ndim == 1:
        t = t[:, None]
    B = x.shape[0]

    # Tile choice: multiple of 8 sublanes, capped so small batches stay small.
    tb = min(tile_b, _round_up(B, 8))
    n_tiles = pl.cdiv(B, tb)
    B_pad = n_tiles * tb
    if B_pad != B:
        x = jnp.pad(x, ((0, B_pad - B), (0, 0)))
        t = jnp.pad(t, ((0, B_pad - B), (0, 0)))

    x = x.astype(jnp.bfloat16)
    t = t.astype(jnp.float32)

    kernel = _make_kernel(dim, dim_p, emb_dim, H)

    flops = 2 * B_pad * (dim * H + T * H + 2 * H * H + H * emb_dim)
    bytes_accessed = (B_pad * (dim * 2 + 1 * 4 + emb_dim * 4)
                      + w_packed.size * 2 + b_packed.size * 4)

    out = pl.pallas_call(
        kernel,
        out_shape=jax.ShapeDtypeStruct((B_pad, emb_dim), jnp.float32),
        grid=(n_tiles,),
        in_specs=[
            pl.BlockSpec((tb, dim), lambda i: (i, 0)),          # x tile
            pl.BlockSpec((tb, 1), lambda i: (i, 0)),            # t tile
            pl.BlockSpec(w_packed.shape, lambda i: (0, 0)),     # weights, resident
            pl.BlockSpec(b_packed.shape, lambda i: (0, 0)),     # biases, resident
        ],
        out_specs=pl.BlockSpec((tb, emb_dim), lambda i: (i, 0)),
        compiler_params=pltpu.CompilerParams(
            dimension_semantics=("parallel",),
            vmem_limit_bytes=32 * 1024 * 1024,
        ),
        cost_estimate=pl.CostEstimate(
            flops=flops, transcendentals=0, bytes_accessed=bytes_accessed),
    )(x, t, w_packed, b_packed)

    return out[:B]


# ---------------------------------------------------------------------------
# Parameter construction / packing
# ---------------------------------------------------------------------------
def init_params(key, dim, emb_dim, time_embed_dim, layer_widths=(64, 64, 64)):
    """Deterministic synthetic parameters. Weights stored as [in, out]."""
    sizes = [dim + time_embed_dim] + list(layer_widths) + [emb_dim]
    keys = jax.random.split(key, 2 + 2 * len(sizes))
    ki = iter(range(len(keys)))

    def lin(kw, kb, fan_in, fan_out):
        w = jax.random.normal(keys[kw], (fan_in, fan_out), jnp.float32) * 0.1
        b = jax.random.normal(keys[kb], (1, fan_out), jnp.float32) * 0.1
        return w, b

    params = {}
    params["wt"], params["bt"] = lin(next(ki), next(ki), 1, time_embed_dim)

    w0, b0 = lin(next(ki), next(ki), sizes[0], sizes[1])
    params["w0x"], params["w0t"] = w0[:dim], w0[dim:]   # split == concat trick
    params["b0"] = b0
    params["w1"], params["b1"] = lin(next(ki), next(ki), sizes[1], sizes[2])
    params["w2"], params["b2"] = lin(next(ki), next(ki), sizes[2], sizes[3])
    params["w3"], params["b3"] = lin(next(ki), next(ki), sizes[3], sizes[4])
    return params


def pack_params(params, dim, time_embed_dim, emb_dim, hidden=64):
    """Packs all matmul weights into one bf16 buffer and biases into one f32 buffer."""
    T, H = time_embed_dim, hidden
    assert T <= H and emb_dim <= H
    assert params["w1"].shape == (H, H) and params["w2"].shape == (H, H)

    dim_p = _round_up(dim, 16)          # bf16 sublane-tile aligned region starts
    K_total = dim_p + 4 * H

    w = jnp.zeros((K_total, H), jnp.float32)
    w = w.at[0:dim, :].set(params["w0x"])                       # W0 (x rows)
    w = w.at[dim_p:dim_p + T, :].set(params["w0t"])             # W0 (t_emb rows)
    w = w.at[dim_p + H:dim_p + 2 * H, :].set(params["w1"])
    w = w.at[dim_p + 2 * H:dim_p + 3 * H, :].set(params["w2"])
    w = w.at[dim_p + 3 * H:dim_p + 4 * H, :emb_dim].set(params["w3"])
    w_packed = w.astype(jnp.bfloat16)

    b = jnp.zeros((8, H), jnp.float32)
    b = b.at[0, :].set(params["b0"][0])
    b = b.at[1, :].set(params["b1"][0])
    b = b.at[2, :].set(params["b2"][0])
    b = b.at[3, :emb_dim].set(params["b3"][0])
    b = b.at[4, :T].set(params["wt"][0])
    b = b.at[5, :T].set(params["bt"][0])

    meta = dict(dim=dim, dim_p=dim_p, T=T, emb_dim=emb_dim, hidden=H)
    return w_packed, b, meta


# ---------------------------------------------------------------------------
# Plain-JAX reference (f32) for sanity checking
# ---------------------------------------------------------------------------
def _reference_forward(x, t, params):
    if t.ndim == 1:
        t = t[:, None]
    t_emb = t * params["wt"] + params["bt"]
    w0 = jnp.concatenate([params["w0x"], params["w0t"]], axis=0)
    xt = jnp.concatenate([x, t_emb], axis=1)
    h = jnp.maximum(xt @ w0 + params["b0"], 0.0)
    h = jnp.maximum(h @ params["w1"] + params["b1"], 0.0)
    h = jnp.maximum(h @ params["w2"] + params["b2"], 0.0)
    return h @ params["w3"] + params["b3"]


if __name__ == "__main__":
    # Small shapes consistent with the module's forward (x: [B, dim], t: [B]).
    B, dim, emb_dim, time_embed_dim = 8, 32, 16, 8

    key = jax.random.PRNGKey(0)
    k_x, k_t, k_p, k_x2, k_t2 = jax.random.split(key, 5)
    x = jax.random.normal(k_x, (B, dim), jnp.float32)
    t = jax.random.uniform(k_t, (B,), jnp.float32)   # 1-D t -> unsqueezed inside

    params = init_params(k_p, dim, emb_dim, time_embed_dim, layer_widths=(64, 64, 64))
    packed = pack_params(params, dim, time_embed_dim, emb_dim, hidden=64)

    # Test 1: tiny batch, single tile.
    out = jax.block_until_ready(generative_geo_ae_forward(x, t, packed))
    ref = _reference_forward(x, t, params)
    assert out.shape == (B, emb_dim)
    assert float(jnp.max(jnp.abs(out - ref))) < 5e-2   # bf16 matmul tolerance

    # Test 2: B not a multiple of 8, multi-tile grid (exercises padding path).
    B2 = 300
    x2 = jax.random.normal(k_x2, (B2, dim), jnp.float32)
    t2 = jax.random.uniform(k_t2, (B2,), jnp.float32)
    out2 = jax.block_until_ready(
        generative_geo_ae_forward(x2, t2, packed, tile_b=128))
    ref2 = _reference_forward(x2, t2, params)
    assert out2.shape == (B2, emb_dim)
    assert float(jnp.max(jnp.abs(out2 - ref2))) < 5e-2

    # TODO(synk): autoencoder.encode/decode (abstract external module) and
    # generate_latent's diffusion sampling loop are not part of forward() and
    # are left out of the kernel.
    print("KERNEL_OK")
</pallas_src>

<mosaic_0001>
module attributes {stable_mosaic.version = 11 : i64} {
  func.func @kernel(%arg0: i32, %arg1: memref<8x32xbf16, #tpu.memory_space<vmem>>, %arg2: memref<8x1xf32, #tpu.memory_space<vmem>>, %arg3: memref<288x64xbf16, #tpu.memory_space<vmem>>, %arg4: memref<8x64xf32, #tpu.memory_space<vmem>>, %arg5: memref<8x16xf32, #tpu.memory_space<vmem>>) attributes {dimension_semantics = [#tpu.dimension_semantics<parallel>], iteration_bounds = array<i64: 1>, scalar_prefetch = 0 : i64, scratch_operands = 0 : i64, tpu.core_type = #tpu.core_type<tc>, window_params = [{transform_indices = @transform_0, window_bounds = array<i64: 8, 32>}, {transform_indices = @transform_1, window_bounds = array<i64: 8, 1>}, {pipeline_mode = #tpu.pipeline_mode<synchronous>, transform_indices = @transform_2, window_bounds = array<i64: 288, 64>}, {pipeline_mode = #tpu.pipeline_mode<synchronous>, transform_indices = @transform_3, window_bounds = array<i64: 8, 64>}, {transform_indices = @transform_4, window_bounds = array<i64: 8, 16>}]} {
    %c0 = arith.constant 0 : index
    %c0_0 = arith.constant 0 : index
    %0 = vector.load %arg1[%c0, %c0_0] : memref<8x32xbf16, #tpu.memory_space<vmem>>, vector<8x32xbf16>
    %c0_1 = arith.constant 0 : index
    %c0_2 = arith.constant 0 : index
    %1 = vector.load %arg2[%c0_1, %c0_2] : memref<8x1xf32, #tpu.memory_space<vmem>>, vector<8x1xf32>
    %c4 = arith.constant 4 : index
    %c0_3 = arith.constant 0 : index
    %2 = vector.load %arg4[%c4, %c0_3] : memref<8x64xf32, #tpu.memory_space<vmem>>, vector<1x64xf32>
    %3 = vector.broadcast %1 : vector<8x1xf32> to vector<8x64xf32>
    %4 = vector.broadcast %2 : vector<1x64xf32> to vector<8x64xf32>
    %5 = arith.mulf %3, %4 : vector<8x64xf32>
    %c5 = arith.constant 5 : index
    %c0_4 = arith.constant 0 : index
    %6 = vector.load %arg4[%c5, %c0_4] : memref<8x64xf32, #tpu.memory_space<vmem>>, vector<1x64xf32>
    %7 = vector.broadcast %6 : vector<1x64xf32> to vector<8x64xf32>
    %8 = arith.addf %5, %7 : vector<8x64xf32>
    %9 = arith.truncf %8 : vector<8x64xf32> to vector<8x64xbf16>
    %c0_5 = arith.constant 0 : index
    %c0_6 = arith.constant 0 : index
    %10 = vector.load %arg3[%c0_5, %c0_6] : memref<288x64xbf16, #tpu.memory_space<vmem>>, vector<32x64xbf16>
    %cst = arith.constant dense<0.000000e+00> : vector<8x64xf32>
    %11 = tpu.matmul %0, %10, %cst {dimension_numbers = #tpu.dot_dimension_numbers<[1], [0], [0], [1], [0, 0, 1, 1], [], []>} : vector<8x32xbf16>, vector<32x64xbf16>, vector<8x64xf32> -> vector<8x64xf32>
    %c32 = arith.constant 32 : index
    %c0_7 = arith.constant 0 : index
    %12 = vector.load %arg3[%c32, %c0_7] : memref<288x64xbf16, #tpu.memory_space<vmem>>, vector<64x64xbf16>
    %cst_8 = arith.constant dense<0.000000e+00> : vector<8x64xf32>
    %13 = tpu.matmul %9, %12, %cst_8 {dimension_numbers = #tpu.dot_dimension_numbers<[1], [0], [0], [1], [0, 0, 1, 1], [], []>} : vector<8x64xbf16>, vector<64x64xbf16>, vector<8x64xf32> -> vector<8x64xf32>
    %14 = arith.addf %11, %13 : vector<8x64xf32>
    %c0_9 = arith.constant 0 : index
    %c0_10 = arith.constant 0 : index
    %15 = vector.load %arg4[%c0_9, %c0_10] : memref<8x64xf32, #tpu.memory_space<vmem>>, vector<1x64xf32>
    %16 = vector.broadcast %15 : vector<1x64xf32> to vector<8x64xf32>
    %17 = arith.addf %14, %16 : vector<8x64xf32>
    %cst_11 = arith.constant 0.000000e+00 : f32
    %18 = vector.broadcast %cst_11 : f32 to vector<8x64xf32>
    %19 = arith.maximumf %17, %18 : vector<8x64xf32>
    %20 = arith.truncf %19 : vector<8x64xf32> to vector<8x64xbf16>
    %c96 = arith.constant 96 : index
    %c0_12 = arith.constant 0 : index
    %21 = vector.load %arg3[%c96, %c0_12] : memref<288x64xbf16, #tpu.memory_space<vmem>>, vector<64x64xbf16>
    %cst_13 = arith.constant dense<0.000000e+00> : vector<8x64xf32>
    %22 = tpu.matmul %20, %21, %cst_13 {dimension_numbers = #tpu.dot_dimension_numbers<[1], [0], [0], [1], [0, 0, 1, 1], [], []>} : vector<8x64xbf16>, vector<64x64xbf16>, vector<8x64xf32> -> vector<8x64xf32>
    %c1 = arith.constant 1 : index
    %c0_14 = arith.constant 0 : index
    %23 = vector.load %arg4[%c1, %c0_14] : memref<8x64xf32, #tpu.memory_space<vmem>>, vector<1x64xf32>
    %24 = vector.broadcast %23 : vector<1x64xf32> to vector<8x64xf32>
    %25 = arith.addf %22, %24 : vector<8x64xf32>
    %cst_15 = arith.constant 0.000000e+00 : f32
    %26 = vector.broadcast %cst_15 : f32 to vector<8x64xf32>
    %27 = arith.maximumf %25, %26 : vector<8x64xf32>
    %28 = arith.truncf %27 : vector<8x64xf32> to vector<8x64xbf16>
    %c160 = arith.constant 160 : index
    %c0_16 = arith.constant 0 : index
    %29 = vector.load %arg3[%c160, %c0_16] : memref<288x64xbf16, #tpu.memory_space<vmem>>, vector<64x64xbf16>
    %cst_17 = arith.constant dense<0.000000e+00> : vector<8x64xf32>
    %30 = tpu.matmul %28, %29, %cst_17 {dimension_numbers = #tpu.dot_dimension_numbers<[1], [0], [0], [1], [0, 0, 1, 1], [], []>} : vector<8x64xbf16>, vector<64x64xbf16>, vector<8x64xf32> -> vector<8x64xf32>
    %c2 = arith.constant 2 : index
    %c0_18 = arith.constant 0 : index
    %31 = vector.load %arg4[%c2, %c0_18] : memref<8x64xf32, #tpu.memory_space<vmem>>, vector<1x64xf32>
    %32 = vector.broadcast %31 : vector<1x64xf32> to vector<8x64xf32>
    %33 = arith.addf %30, %32 : vector<8x64xf32>
    %cst_19 = arith.constant 0.000000e+00 : f32
    %34 = vector.broadcast %cst_19 : f32 to vector<8x64xf32>
    %35 = arith.maximumf %33, %34 : vector<8x64xf32>
    %36 = arith.truncf %35 : vector<8x64xf32> to vector<8x64xbf16>
    %c224 = arith.constant 224 : index
    %c0_20 = arith.constant 0 : index
    %37 = vector.load %arg3[%c224, %c0_20] : memref<288x64xbf16, #tpu.memory_space<vmem>>, vector<64x64xbf16>
    %cst_21 = arith.constant dense<0.000000e+00> : vector<8x64xf32>
    %38 = tpu.matmul %36, %37, %cst_21 {dimension_numbers = #tpu.dot_dimension_numbers<[1], [0], [0], [1], [0, 0, 1, 1], [], []>} : vector<8x64xbf16>, vector<64x64xbf16>, vector<8x64xf32> -> vector<8x64xf32>
    %c3 = arith.constant 3 : index
    %c0_22 = arith.constant 0 : index
    %39 = vector.load %arg4[%c3, %c0_22] : memref<8x64xf32, #tpu.memory_space<vmem>>, vector<1x64xf32>
    %40 = vector.broadcast %39 : vector<1x64xf32> to vector<8x64xf32>
    %41 = arith.addf %38, %40 : vector<8x64xf32>
    %42 = vector.extract_strided_slice %41 {offsets = [0, 0], sizes = [8, 16], strides = [1, 1]} : vector<8x64xf32> to vector<8x16xf32>
    %c0_23 = arith.constant 0 : index
    %c0_24 = arith.constant 0 : index
    %43 = vector.load %arg5[%c0_23, %c0_24] : memref<8x16xf32, #tpu.memory_space<vmem>>, vector<8x16xf32>
    tpu.vector_store %arg5[%c0_23, %c0_24], %42 {strides = array<i32>} : memref<8x16xf32, #tpu.memory_space<vmem>>, vector<8x16xf32>,
    return
  }
  func.func @transform_0(%arg0: i32) -> (i32, i32) {
    %c0_i32 = arith.constant 0 : i32
    %c0_i32_0 = arith.constant 0 : i32
    return %arg0, %c0_i32 : i32, i32
  }
  func.func @transform_1(%arg0: i32) -> (i32, i32) {
    %c0_i32 = arith.constant 0 : i32
    %c0_i32_0 = arith.constant 0 : i32
    return %arg0, %c0_i32 : i32, i32
  }
  func.func @transform_2(%arg0: i32) -> (i32, i32) {
    %c0_i32 = arith.constant 0 : i32
    %c0_i32_0 = arith.constant 0 : i32
    %c0_i32_1 = arith.constant 0 : i32
    return %c0_i32, %c0_i32_0 : i32, i32
  }
  func.func @transform_3(%arg0: i32) -> (i32, i32) {
    %c0_i32 = arith.constant 0 : i32
    %c0_i32_0 = arith.constant 0 : i32
    %c0_i32_1 = arith.constant 0 : i32
    return %c0_i32, %c0_i32_0 : i32, i32
  }
  func.func @transform_4(%arg0: i32) -> (i32, i32) {
    %c0_i32 = arith.constant 0 : i32
    %c0_i32_0 = arith.constant 0 : i32
    return %arg0, %c0_i32 : i32, i32
  }
}

</mosaic_0001>

<bundles_post_ra>
// kernel: tpu_custom_call.1
= control target key start
LH: loop header
LB: loop body
LE: loop exit
PB: predicated region body
PF: predicated region fallthrough
CT: control target
= control target key end

     0   :  { %v596_v2 = vmov 0   ;;  %v597_v3 = vmov 0.0   ;;  %vm598_vm0 = vmmov 0   ;;  %vm131_vm1 = vcmask 261120   ;;  %s738_s0 = inlined_call_operand.vmem [shape: bf16[8,32], index: 0, kind: input, shape index: {}]   ;;  %s739_s1 = inlined_call_operand.vmem [shape: f32[8,1], index: 1, kind: input, shape index: {}]   ;;  %s740_s2 = inlined_call_operand.vmem [shape: bf16[288,64], index: 2, kind: input, shape index: {}]   ;;  %s741_s3 = inlined_call_operand.vmem [shape: f32[8,64], index: 3, kind: input, shape index: {}]   ;;  %s742_s4 = inlined_call_operand.hbm [shape: f32[8,16], index: 4, kind: output, shape index: {}]  }
   0x1   :  { %v20_v0 = vld [vmem:[%s739_s1] sm:$0xff]  ;;  %v556_v1 = vld [vmem:[%s740_s2 + $0x28] sm:$0xff]   ;;  %555 = vset.pattern.permute.xlu0 %v596_v2  ;;  %495 = vmatprep.subr.bf16.mxu0 %v597_v3  ;;  %v560_v7 = vld [vmem:[%s740_s2 + $0x18] sm:$0xff]  }
   0x2   :  { %24 = vperm.xlu0 %555, %v20_v0   ;;  %496 = vmatpush3.bf16.msra.mxu0 %v556_v1  ;;  %v557_v4 = vld [vmem:[%s740_s2 + $0x8] sm:$0xff]   ;;  %v558_v5 = vld [vmem:[%s740_s2 + $0x20] sm:$0xff]   ;;  %v561_v9 = vld [vmem:[%s740_s2 + $0x10] sm:$0xff]  }
   0x3   :  { %507 = vmatprep.subr.bf16.mxu1 %v597_v3  ;;  %497 = vmatprep.subr.bf16.mxu0 %v597_v3  ;;  %v559_v6 = vld [vmem:[%s740_s2] sm:$0xff]  }
   0x4   :  { %508 = vmatpush3.bf16.msra.mxu1 %v557_v4  ;;  %511 = vmatprep.mubr.msk.bf16.mxu1 %vm598_vm0, %v597_v3  ;;  %v19_v8 = vld [vmem:[%s738_s0] sm:$0xf] }
   0x5   :  { %509 = vmatprep.subr.bf16.mxu1 %v597_v3  ;;  %503 = vmatprep.mubr.msk.bf16.mxu0 %vm598_vm0, %v597_v3 }
   0x6   :  { %498 = vmatpush3.bf16.msra.mxu0 %v558_v5 }
   0x7   :  { %499 = vmatprep.subr.bf16.mxu0 %v597_v3 }
   0x8   :  { %510 = vmatpush3.bf16.msra.mxu1 %v559_v6 }
   0x9   :  { %515 = vmatprep.subr.bf16.mxu1 %v597_v3 }
   0xa   :  { %500 = vmatpush3.bf16.msra.mxu0 %v560_v7 }
   0xb   :  { %512 = vmatmul.mubr.msk.bf16.vlgmr.msra.gmra.mxu1 %vm131_vm1, %v19_v8  ;;  %501 = vmatprep.subr.bf16.mxu0 %v597_v3 }
   0xc   :  { %523 = vmatprep.mubr.msk.bf16.mxu1 %vm598_vm0, %v597_v3 }
   0xe   :  { %502 = vmatpush3.bf16.msra.mxu0 %v561_v9 }
   0xf   :  { %527 = vmatprep.subr.bf16.mxu0 %v597_v3 }
  0x10   :  { %9 = vsyncpa [#allocation3], 0  ;;  %v562_v10 = vld [vmem:[%s740_s2 + $0x48] sm:$0xff]   ;;  %v563_v11 = vld [vmem:[%s740_s2 + $0x40] sm:$0xff]   ;;  %vm75_vm2 = vcmask 523264   ;;  %s599_s11 = smov [#allocation2]  }
  0x11   :  { %516 = vmatpush3.bf16.msra.mxu1 %v562_v10  ;;  %v443_v12 = vld [vmem:[%s741_s3 + $0x4] ss:$0 sm:$0xff]  ;;  %v444_v13 = vld [vmem:[%s741_s3 + $0x5] ss:$0 sm:$0xff]  ;;  %v564_v18 = vld [vmem:[%s740_s2 + $0x38] sm:$0xff]   ;;  %vm427_vm3 = vcmask 130048  }
  0x12   :  { %517 = vmatprep.subr.bf16.mxu1 %v597_v3  ;;  %v565_v19 = vld [vmem:[%s740_s2 + $0x30] sm:$0xff]   ;;  %v566_v22 = vld [vmem:[%s740_s2 + $0x68] sm:$0xff]   ;;  %v567_v24 = vld [vmem:[%s740_s2 + $0x60] sm:$0xff]  }
  0x13   :  { %v453_v27 = vld [vmem:[%s741_s3] ss:$0 sm:$0xff]  ;;  %v568_v35 = vld [vmem:[%s740_s2 + $0x58] sm:$0xff]   ;;  %v569_v36 = vld [vmem:[%s740_s2 + $0x50] sm:$0xff]  }
  0x14   :  { %v570_v37 = vld [vmem:[%s740_s2 + $0x88] sm:$0xff]   ;;  %v571_v38 = vld [vmem:[%s740_s2 + $0x80] sm:$0xff]   ;;  %v572_v47 = vld [vmem:[%s740_s2 + $0x78] sm:$0xff]  }
  0x15   :  { %518 = vmatpush3.bf16.msra.mxu1 %v563_v11  ;;  %v454_v39 = vld [vmem:[%s741_s3 + $0x1] ss:$0 sm:$0xff]  ;;  %v573_v48 = vld [vmem:[%s740_s2 + $0x70] sm:$0xff]   ;;  %v460_v49 = vld [vmem:[%s741_s3 + $0x2] ss:$0 sm:$0xff]  ;;  %s435_s2 = sshll.u32 %s599_s11, 4  ;;  %s436_s2 = int_to_ptr.vmem [resolvable:$true] %s435_s2 }
  0x16   :  { %519 = vmatprep.subr.bf16.mxu1 %v597_v3  ;;  %v466_v57 = vld [vmem:[%s741_s3 + $0x3] ss:$0 sm:$0xff]  ;;  %s574_s12 = scalar_lea.vmem %s436_s2, 128  ;;  %p579_p1 = scmp.lt.s32.totalorder %s436_s2, %s436_s2 }
  0x17   :  { %p575_p0 = scmp.ne.s32.totalorder %s436_s2, %s574_s12  ;;  %p580_p2 = scmp.lt.s32.totalorder %s574_s12, %s574_s12 }
  0x19   :  { %520 = vmatpush3.bf16.msra.mxu1 %v564_v18  ;;  %p581_p3 = por %p580_p2, %p579_p1 }
  0x1a   :  { %521 = vmatprep.subr.bf16.mxu1 %v597_v3 }
  0x1b   :  { %p582_p4 = pnand %p581_p3, %p575_p0 }
  0x1d   :  { %522 = vmatpush3.bf16.msra.mxu1 %v565_v19 }
  0x1e   :  { %539 = vmatprep.subr.bf16.mxu1 %v597_v3 }
  0x7d   :  { %v25_v14 = vpop.permute.xlu0 %24 }
  0x7e   :  { %v31_v15 = vmul.f32 %v443_v12, %v25_v14 }
  0x80   :  { %v37_v16 = vadd.f32 %v444_v13, %v31_v15 }
  0x82   :  { %v38_v17 = vpack.c.bf16 %v37_v16, %v37_v16 }
  0x84   :  { %504 = vmatmul.mubr.msk.bf16.vlgmr.msra.gmra.mxu0 %vm75_vm2, %v38_v17 }
  0x85   :  { %535 = vmatprep.mubr.msk.bf16.mxu0 %vm598_vm0, %v597_v3  ;;  %528 = vmatpush3.bf16.msra.mxu0 %v566_v22 }
  0x86   :  { %529 = vmatprep.subr.bf16.mxu0 %v597_v3 }
  0x89   :  { %530 = vmatpush3.bf16.msra.mxu0 %v567_v24 }
  0x8a   :  { %531 = vmatprep.subr.bf16.mxu0 %v597_v3 }
  0x8d   :  { %532 = vmatpush3.bf16.msra.mxu0 %v568_v35 }
  0x8e   :  { %533 = vmatprep.subr.bf16.mxu0 %v597_v3 }
  0x91   :  { %534 = vmatpush3.bf16.msra.mxu0 %v569_v36 }
  0xcb   :  { %v169_v20 = vpop.f32.mrf.mxu1 }
  0xcd   :  { %v513_v21 = vpop.f32.mrf.mxu1 }
  0xcf   :  { %v172_v23 = vpop.f32.mrf.mxu1 }
  0xd1   :  { %v514_v25 = vpop.f32.mrf.mxu1 }
 0x144   :  { %v113_v26 = vpop.f32.mrf.mxu0 }
 0x145   :  { %v170_v28 = vadd.f32 %v169_v20, %v113_v26 }
 0x146   :  { %v505_v29 = vpop.f32.mrf.mxu0 }
 0x147   :  { %v180_v30 = vadd.f32 %v453_v27, %v170_v28 }
 0x148   :  { %v116_v31 = vpop.f32.mrf.mxu0 }
 0x149   :  { %v181_v32 = vmax.f32 %v180_v30, 0.0 }
 0x14a   :  { %v506_v33 = vpop.f32.mrf.mxu0 }
 0x14b   :  { %v182_v34 = vpack.c.bf16 %v181_v32, %v181_v32 }
 0x14d   :  { %524 = vmatmul.mubr.msk.bf16.vlgmr.msra.gmra.mxu1 %vm75_vm2, %v182_v34 }
 0x14e   :  { %547 = vmatprep.mubr.msk.bf16.mxu1 %vm598_vm0, %v597_v3  ;;  %540 = vmatpush3.bf16.msra.mxu1 %v570_v37 }
 0x14f   :  { %541 = vmatprep.subr.bf16.mxu1 %v597_v3 }
 0x152   :  { %542 = vmatpush3.bf16.msra.mxu1 %v571_v38 }
 0x153   :  { %543 = vmatprep.subr.bf16.mxu1 %v597_v3 }
 0x156   :  { %544 = vmatpush3.bf16.msra.mxu1 %v572_v47 }
 0x157   :  { %545 = vmatprep.subr.bf16.mxu1 %v597_v3 }
 0x15a   :  { %546 = vmatpush3.bf16.msra.mxu1 %v573_v48 }
 0x20d   :  { %v257_v40 = vpop.f32.mrf.mxu1 }
 0x20e   :  { %v258_v41 = vadd.f32 %v454_v39, %v257_v40 }
 0x20f   :  { %v525_v42 = vpop.f32.mrf.mxu1 }
 0x210   :  { %v263_v43 = vmax.f32 %v258_v41, 0.0 }
 0x211   :  { %v260_v44 = vpop.f32.mrf.mxu1 }
 0x212   :  { %v264_v45 = vpack.c.bf16 %v263_v43, %v263_v43 }
 0x213   :  { %v526_v46 = vpop.f32.mrf.mxu1 }
 0x214   :  { %536 = vmatmul.mubr.msk.bf16.vlgmr.msra.gmra.mxu0 %vm75_vm2, %v264_v45 }
 0x2d4   :  { %v339_v50 = vpop.f32.mrf.mxu0 }
 0x2d5   :  { %v340_v51 = vadd.f32 %v460_v49, %v339_v50 }
 0x2d6   :  { %v537_v52 = vpop.f32.mrf.mxu0 }
 0x2d7   :  { %v345_v53 = vmax.f32 %v340_v51, 0.0 }
 0x2d8   :  { %v342_v54 = vpop.f32.mrf.mxu0 }
 0x2d9   :  { %v346_v55 = vpack.c.bf16 %v345_v53, %v345_v53 }
 0x2da   :  { %v538_v56 = vpop.f32.mrf.mxu0 }
 0x2db   :  { %548 = vmatmul.mubr.msk.bf16.vlgmr.msra.gmra.mxu1 %vm75_vm2, %v346_v55 }
 0x39b   :  { %v421_v58 = vpop.f32.mrf.mxu1 }
 0x39c   :  { %v422_v59 = vadd.f32 %v466_v57, %v421_v58 }
 0x39d   :  { %v549_v60 = vpop.f32.mrf.mxu1 }
 0x39e   :  { %428 = vst.msk [vmem:[#allocation2] sm:$0xff] %vm427_vm3, %v422_v59 }
 0x39f   :  { %v424_v61 = vpop.f32.mrf.mxu1 }
 0x3a0   :  { %585 = shalt.err (!%p582_p4)
}
 0x3a1   :  { %438 = dma.vmem_to_hbm [thread:$0]  %s436_s2, 128, %s742_s4, [#allocation3]   ;;  %v550_v62 = vpop.f32.mrf.mxu1 }
 0x3a2   :  { %594 = dma.done.wait [#allocation3], 128  }
 0x3a3   :  { %595 = vsyncadd [#allocation3], 4294967168 }
 0x3a4   :  { %442 = vsyncpa [#allocation3], 1 }

</bundles_post_ra>
